<compile_context>
chip_gen: v6e
topology: v6e:2x2x1
jax: 0.10.0
libtpu: 0.0.40
codegen_flags: <defaults>
</compile_context>

<pallas_src>
import math
from functools import partial

import numpy as np
import jax
import jax.numpy as jnp
from jax.experimental import pallas as pl
from jax.experimental.pallas import tpu as pltpu

LN_EPS = 1e-12  # BertConfig default layer_norm_eps


# ----------------------------- shared math helpers -----------------------------

def _gelu(x):
    # tanh-approximate GELU (EUP tanh); HF Bert uses erf-GELU, diff ~1e-3.
    # TODO(synk): switch to erf-GELU if exact module parity is required.
    return jax.nn.gelu(x, approximate=True)


def _layer_norm(x, gamma, beta, eps=LN_EPS):
    mu = jnp.mean(x, axis=-1, keepdims=True)
    var = jnp.mean(jnp.square(x - mu), axis=-1, keepdims=True)
    return (x - mu) * jax.lax.rsqrt(var + eps) * gamma + beta


def _pick_tile(n, cap):
    """Largest multiple of 8 that divides n and is <= cap; falls back to the full extent."""
    t = (min(cap, n) // 8) * 8
    while t >= 8:
        if n % t == 0:
            return t
        t -= 8
    return n


# ----------------------------- lane-dense pointwise (1x1) conv -----------------------------

def _pointwise_conv_kernel(x_ref, w_ref, b_ref, o_ref):
    # x: (tm, K) f32, w: (K, N) bf16, b: (1, N) f32 -> o: (tm, N); bf16 MXU, f32 accumulate.
    o_ref[...] = (jnp.dot(x_ref[...].astype(jnp.bfloat16), w_ref[...],
                          preferred_element_type=jnp.float32)
                  + b_ref[...]).astype(o_ref.dtype)


def pointwise_conv(x, w, b, *, pack=8, row_cap=128):
    """1x1 Conv1d on channels-last tokens: (B, L, Cin) -> (B, L, Cout).

    Tokens are packed `pack`-per-row and the weight expanded to a block-diagonal
    (pack*Cin, pack*Cout) matrix, so both input (pack*Cin = 128 lanes) and output
    (pack*Cout = 384 lanes) rows are lane-dense: no masked 48-lane stores and no 8-16x
    lane padding of the narrow Cin rows.  Math is identical to per-token x @ w + b.
    """
    B, L, Cin = x.shape
    Cout = w.shape[1]
    M = B * L
    if M % pack == 0:
        R = M // pack
        xp = x.reshape(R, pack * Cin)
        wp = jnp.kron(jnp.eye(pack, dtype=jnp.float32), w).astype(jnp.bfloat16)
        bp = jnp.tile(b, pack).reshape(1, pack * Cout)
        tm = _pick_tile(R, row_cap)        # <=128 rows = <=1024 tokens per step (v5e-friendly)
        out = pl.pallas_call(
            _pointwise_conv_kernel,
            out_shape=jax.ShapeDtypeStruct((R, pack * Cout), x.dtype),
            grid=(R // tm,),
            in_specs=[
                pl.BlockSpec((tm, pack * Cin), lambda i: (i, 0)),
                pl.BlockSpec((pack * Cin, pack * Cout), lambda i: (0, 0)),
                pl.BlockSpec((1, pack * Cout), lambda i: (0, 0)),
            ],
            out_specs=pl.BlockSpec((tm, pack * Cout), lambda i: (i, 0)),
            compiler_params=pltpu.CompilerParams(dimension_semantics=("parallel",)),
        )(xp, wp, bp)
        return out.reshape(B, L, Cout)
    # fallback (token count not a multiple of `pack`): token-major tiles, masked Cout stores.
    xf = x.reshape(M, Cin)
    tm = _pick_tile(M, 1024)
    out = pl.pallas_call(
        _pointwise_conv_kernel,
        out_shape=jax.ShapeDtypeStruct((M, Cout), x.dtype),
        grid=(M // tm,),
        in_specs=[
            pl.BlockSpec((tm, Cin), lambda i: (i, 0)),
            pl.BlockSpec((Cin, Cout), lambda i: (0, 0)),
            pl.BlockSpec((1, Cout), lambda i: (0, 0)),
        ],
        out_specs=pl.BlockSpec((tm, Cout), lambda i: (i, 0)),
        compiler_params=pltpu.CompilerParams(dimension_semantics=("parallel",)),
    )(xf, w.astype(jnp.bfloat16), b.reshape(1, Cout))
    return out.reshape(B, L, Cout)


# ----------------------------- fused lateral-conv + flash cross-attention -----------------------------

def _fused_conv_flash_kernel(up_ref, xin_ref,
                             wc_ref, bc_ref,
                             wq_ref, bq_ref, wkv_ref, bkv_ref,
                             wo_ref, bo_ref, g1_ref, be1_ref,
                             wi_ref, bi_ref, w2_ref, b2_ref, g2_ref, be2_ref,
                             o_ref,
                             q_ref, m_ref, l_ref, acc_ref, *, num_heads):
    """Fused {fine-level lateral 1x1 conv} + {BERT-style cross-attention layer}, flash-tiled.

    grid = (B, Lq/tq, Lk/tk); the last (Lk) axis is the online-softmax reduction axis.
      up : (1, tq, C)   query / residual tokens (bicubic-upsampled coarse lateral)
      x  : (1, tk, Cin) raw fine-level tokens -> fused lateral conv -> K/V chunk
    """
    ki = pl.program_id(2)
    nk = pl.num_programs(2)
    bf16 = jnp.bfloat16

    up = up_ref[0]                                     # (tq, C) f32, resident across ki
    x = xin_ref[0]                                     # (tk, Cin) f32
    C = up.shape[1]
    d = C // num_heads

    @pl.when(ki == 0)
    def _():
        # init online-softmax state + cache the Q projection for this (b, q-tile).
        m_ref[...] = jnp.full_like(m_ref, -jnp.inf)
        l_ref[...] = jnp.zeros_like(l_ref)
        acc_ref[...] = jnp.zeros_like(acc_ref)
        # fused Q projection, N=C wide (1/sqrt(d) pre-folded into wq/bq by the wrapper).
        q_ref[...] = (jnp.dot(up.astype(bf16), wq_ref[...],
                              preferred_element_type=jnp.float32)
                      + bq_ref[...]).astype(bf16)

    # fused fine-level lateral 1x1 conv for this K/V chunk (bf16 MXU, f32 accumulate)
    enc = (jnp.dot(x.astype(bf16), wc_ref[...], preferred_element_type=jnp.float32)
           + bc_ref[...])                               # (tk, C)
    # fused K/V projection: a single (tk, 2C) matmul instead of 2*num_heads N=d ones
    kv = (jnp.dot(enc.astype(bf16), wkv_ref[...], preferred_element_type=jnp.float32)
          + bkv_ref[...]).astype(bf16)                  # (tk, 2C)
    q = q_ref[...]                                      # (tq, C) bf16

    # Static unroll over heads: the slices below are static lane slices of resident buffers.
    # (num_heads=4 with tq/tk<=128 keeps vreg pressure modest; re-check spill before raising tiles.)
    for h in range(num_heads):
        qh = q[:, h * d:(h + 1) * d]                    # (tq, d)
        kh = kv[:, h * d:(h + 1) * d]                   # (tk, d)
        vh = kv[:, C + h * d:C + (h + 1) * d]           # (tk, d)
        s = jax.lax.dot_general(qh, kh, (((1,), (1,)), ((), ())),
                                preferred_element_type=jnp.float32)    # (tq, tk)
        m_prev = m_ref[h]
        m_new = jnp.maximum(m_prev, jnp.max(s, axis=-1, keepdims=True))
        alpha = jnp.exp(m_prev - m_new)
        # NOTE: with d=12 this exp is the EUP-saturating op, not the MXU.
        # TODO(synk): compute it in bf16 on v6e/v7x (bf16 EUP); kept f32 for v5e portability.
        p = jnp.exp(s - m_new)
        l_ref[h] = alpha * l_ref[h] + jnp.sum(p, axis=-1, keepdims=True)
        acc_ref[h] = alpha * acc_ref[h] + jnp.dot(p.astype(bf16), vh,
                                                  preferred_element_type=jnp.float32)
        m_ref[h] = m_new

    @pl.when(ki == nk - 1)
    def _():
        # finalize: per-head normalize, output projection accumulated per head (no concat),
        # add&norm, FFN, add&norm.
        attn = bo_ref[...]                              # (1, C) f32, broadcasts
        for h in range(num_heads):
            ctx_h = acc_ref[h] * pl.reciprocal(l_ref[h], approx=True)   # (tq, d)
            attn = attn + jnp.dot(ctx_h.astype(bf16), wo_ref[h],
                                  preferred_element_type=jnp.float32)
        x1 = _layer_norm(attn + up, g1_ref[...], be1_ref[...])
        inter = _gelu(jnp.dot(x1.astype(bf16), wi_ref[...],
                              preferred_element_type=jnp.float32) + bi_ref[...])
        ffn = jnp.dot(inter.astype(bf16), w2_ref[...],
                      preferred_element_type=jnp.float32) + b2_ref[...]
        o_ref[0] = _layer_norm(ffn + x1, g2_ref[...], be2_ref[...]).astype(o_ref.dtype)


def fused_conv_crossattn(up, fine_in, conv_p, attn_p, num_heads, *, tq_cap=128, tk_cap=128):
    """(B, Lq, C) queries x raw (B, Lk, Cin) fine tokens -> (B, Lq, C) updated lateral."""
    B, Lq, C = up.shape
    _, Lk, Cin = fine_in.shape
    H = num_heads
    assert C % H == 0, (C, H)
    d = C // H
    I = attn_p["wi"].shape[1]
    bf16 = jnp.bfloat16
    scale = 1.0 / math.sqrt(d)

    # Weights are cast to bf16 once in the wrapper (MXU native); biases / LN params stay f32.
    wc = conv_p["w"].astype(bf16)                                            # (Cin, C)
    bc = conv_p["b"].reshape(1, C)
    wq = (attn_p["wq"] * scale).astype(bf16)                                 # scale folded into Q
    bq = (attn_p["bq"] * scale).reshape(1, C)
    wkv = jnp.concatenate([attn_p["wk"], attn_p["wv"]], axis=1).astype(bf16) # (C, 2C)
    bkv = jnp.concatenate([attn_p["bk"], attn_p["bv"]]).reshape(1, 2 * C)
    wo3 = attn_p["wo"].reshape(H, d, C).astype(bf16)                         # per-head out proj
    bo = attn_p["bo"].reshape(1, C)
    wi = attn_p["wi"].astype(bf16)
    bi = attn_p["bi"].reshape(1, I)
    w2 = attn_p["w2"].astype(bf16)
    b2 = attn_p["b2"].reshape(1, C)
    g1 = attn_p["ln1_g"].reshape(1, C)
    be1 = attn_p["ln1_b"].reshape(1, C)
    g2 = attn_p["ln2_g"].reshape(1, C)
    be2 = attn_p["ln2_b"].reshape(1, C)

    # Tile query and key/value token axes.  Larger tiles amortize the fused K/V recompute
    # per query tile; sweep caps per generation (v7x: smaller VMEM, 2 TensorCores).
    tq = _pick_tile(Lq, tq_cap)
    tk = _pick_tile(Lk, tk_cap)
    nq, nk = Lq // tq, Lk // tk

    def const(shape):
        return pl.BlockSpec(shape, lambda *_: (0,) * len(shape))

    kernel = partial(_fused_conv_flash_kernel, num_heads=H)
    return pl.pallas_call(
        kernel,
        out_shape=jax.ShapeDtypeStruct((B, Lq, C), up.dtype),
        grid_spec=pltpu.PrefetchScalarGridSpec(
            num_scalar_prefetch=0,
            grid=(B, nq, nk),
            in_specs=[
                pl.BlockSpec((1, tq, C), lambda b, qi, ki: (b, qi, 0)),     # up (query/residual)
                pl.BlockSpec((1, tk, Cin), lambda b, qi, ki: (b, ki, 0)),   # raw fine tokens
                # TODO(synk): lane-dense packed (tq/8, 8*C) slabs for up/out once Mosaic
                # reliably lowers the minor-dim (tq,48)<->(tq/8,384) relayout in-kernel.
                const((Cin, C)), const((1, C)),          # lateral conv w, b
                const((C, C)), const((1, C)),            # wq, bq (pre-scaled by 1/sqrt(d))
                const((C, 2 * C)), const((1, 2 * C)),    # wkv, bkv
                const((H, d, C)), const((1, C)),         # wo (per-head), bo
                const((1, C)), const((1, C)),            # ln1 gamma, beta
                const((C, I)), const((1, I)),            # wi, bi
                const((I, C)), const((1, C)),            # w2, b2
                const((1, C)), const((1, C)),            # ln2 gamma, beta
            ],
            out_specs=pl.BlockSpec((1, tq, C), lambda b, qi, ki: (b, qi, 0)),
            scratch_shapes=[
                pltpu.VMEM((tq, C), bf16),               # cached Q projection
                pltpu.VMEM((H, tq, 1), jnp.float32),     # online-softmax running max
                pltpu.VMEM((H, tq, 1), jnp.float32),     # online-softmax running sum
                pltpu.VMEM((H, tq, d), jnp.float32),     # per-head context accumulator
            ],
        ),
        compiler_params=pltpu.CompilerParams(
            dimension_semantics=("parallel", "parallel", "arbitrary"),
            vmem_limit_bytes=48 * 1024 * 1024,           # > v5e/v6e scoped defaults, < v7x physical
        ),
    )(up, fine_in, wc, bc, wq, bq, wkv, bkv, wo3, bo,
      g1, be1, wi, bi, w2, b2, g2, be2)


# ----------------------------- bicubic interpolation (separable, exact) -----------------------------

def _cubic_weights(t, A=-0.75):
    # PyTorch bicubic convolution kernel weights for the 4 taps at offsets -1..2.
    def conv1(x):  # |x| <= 1
        return ((A + 2.0) * x - (A + 3.0)) * x * x + 1.0

    def conv2(x):  # 1 < |x| < 2
        return ((A * x - 5.0 * A) * x + 8.0 * A) * x - 4.0 * A

    return np.array([conv2(t + 1.0), conv1(t), conv1(1.0 - t), conv2(2.0 - t)])


def _bicubic_matrix_1d(out_size, in_size, scale):
    # align_corners=False (PyTorch default): src = (dst + 0.5) / scale - 0.5, border-clamped.
    m = np.zeros((out_size, in_size), dtype=np.float64)
    for o in range(out_size):
        src = (o + 0.5) / scale - 0.5
        i0 = int(np.floor(src))
        t = src - i0
        w = _cubic_weights(t)
        for tap in range(4):
            idx = min(max(i0 - 1 + tap, 0), in_size - 1)
            m[o, idx] += w[tap]
    return m


def separable_bicubic_upsample(x, hw_in, hw_out, scale):
    """Exact separable bicubic resample of (B, L_in, C) h-major tokens -> (B, L_out, C).

    Equivalent to applying kron(Wh, Ww) but never materializes the O(Lout*Lin) matrix.
    NOTE: a single scalar `scale` is used for both axes, mirroring the torch module's
    scalar F.interpolate scale_factor (shapes[i-1][0] / shapes[i][0]).
    """
    B, _, C = x.shape
    h_in, w_in = hw_in
    h_out, w_out = hw_out
    mh = jnp.asarray(_bicubic_matrix_1d(h_out, h_in, scale), jnp.float32)
    mw = jnp.asarray(_bicubic_matrix_1d(w_out, w_in, scale), jnp.float32)
    P = jax.lax.Precision.HIGHEST
    x4 = x.reshape(B, h_in, w_in, C)
    t = jnp.einsum('oh,bhwc->bowc', mh, x4, precision=P)     # H pass
    y = jnp.einsum('pw,bowc->bopc', mw, t, precision=P)      # W pass
    return y.reshape(B, h_out * w_out, C)


def bicubic_matrix_2d(h_in, w_in, h_out, w_out, scale):
    # kron form, kept ONLY for the pure-JAX reference cross-check of the separable path.
    mh = _bicubic_matrix_1d(h_out, h_in, scale)
    mw = _bicubic_matrix_1d(w_out, w_in, scale)
    return jnp.asarray(np.kron(mh, mw), dtype=jnp.float32)   # (h_out*w_out, h_in*w_in)


# ----------------------------- FPNCrossAttn1D forward (Pallas) -----------------------------

def fpn_crossattn_1d(params, inputs, shapes, *, patch_size, num_heads):
    # Implemented for the 2-level configuration exercised here (token-major laterals throughout).
    n = len(inputs)
    laterals = [None] * n
    # coarsest level: standalone lane-dense lateral conv (finer levels' convs are fused below)
    laterals[n - 1] = pointwise_conv(inputs[n - 1],
                                     params["lateral"][n - 1]["w"],
                                     params["lateral"][n - 1]["b"])
    # top-down: separable bicubic upsample (linear prep) + fused {conv + flash cross-attn} kernel
    for i in range(n - 1, 0, -1):
        h_in, w_in = shapes[i]
        h_out, w_out = shapes[i - 1]
        scale = h_out / h_in                         # scalar scale_factor, as in torch module
        up = separable_bicubic_upsample(laterals[i], (h_in, w_in), (h_out, w_out), scale)
        laterals[i - 1] = fused_conv_crossattn(up, inputs[i - 1],
                                               params["lateral"][i - 1],
                                               params["fpn"][i], num_heads)
    # un-patchify each level to image space (B, 3, H*p, W*p); pure layout transform in JAX
    feats = []
    for i in range(n):
        h, w = shapes[i]
        x = laterals[i]                              # (B, h*w, C); C == p*p*3 (use_norm_pred=False)
        x = x.reshape(x.shape[0], h, w, patch_size, patch_size, 3)
        x = jnp.einsum('nhwpqc->nchpwq', x)
        x = x.reshape(x.shape[0], 3, h * patch_size, w * patch_size)
        feats.append(x)
    return tuple(feats)
    # TODO(synk): use_norm_pred=True branch (LayerNorm + Linear pred head) not exercised here.


# ----------------------------- pure-JAX reference (for sanity check) -----------------------------

def _ref_cross_attn(h, e, p, num_heads):
    P = jax.lax.Precision.HIGHEST
    B, Lq, C = h.shape
    _, Lk, _ = e.shape
    d = C // num_heads

    def dense(x, w, b):
        return jnp.einsum('blc,cd->bld', x, w, precision=P) + b

    q = dense(h, p["wq"], p["bq"]).reshape(B, Lq, num_heads, d).transpose(0, 2, 1, 3)
    k = dense(e, p["wk"], p["bk"]).reshape(B, Lk, num_heads, d).transpose(0, 2, 1, 3)
    v = dense(e, p["wv"], p["bv"]).reshape(B, Lk, num_heads, d).transpose(0, 2, 1, 3)
    s = jnp.einsum('bhqd,bhkd->bhqk', q, k, precision=P) / math.sqrt(d)
    pr = jax.nn.softmax(s, axis=-1)
    ctx = jnp.einsum('bhqk,bhkd->bhqd', pr, v, precision=P).transpose(0, 2, 1, 3).reshape(B, Lq, C)
    attn = dense(ctx, p["wo"], p["bo"])
    x1 = _layer_norm(attn + h, p["ln1_g"], p["ln1_b"])
    inter = _gelu(jnp.einsum('blc,ci->bli', x1, p["wi"], precision=P) + p["bi"])
    ffn = jnp.einsum('bli,ic->blc', inter, p["w2"], precision=P) + p["b2"]
    return _layer_norm(ffn + x1, p["ln2_g"], p["ln2_b"])


def reference_forward(params, inputs, shapes, *, patch_size, num_heads):
    P = jax.lax.Precision.HIGHEST
    laterals = [jnp.einsum('blc,cd->bld', x, params["lateral"][i]["w"], precision=P)
                + params["lateral"][i]["b"] for i, x in enumerate(inputs)]
    n = len(laterals)
    for i in range(n - 1, 0, -1):
        h_in, w_in = shapes[i]
        h_out, w_out = shapes[i - 1]
        m = bicubic_matrix_2d(h_in, w_in, h_out, w_out, h_out / h_in)   # kron reference path
        up = jnp.einsum('pl,blc->bpc', m, laterals[i], precision=P)
        laterals[i - 1] = _ref_cross_attn(up, laterals[i - 1], params["fpn"][i], num_heads)
    feats = []
    for i in range(n):
        h, w = shapes[i]
        x = laterals[i]
        x = x.reshape(x.shape[0], h, w, patch_size, patch_size, 3)
        x = jnp.einsum('nhwpqc->nchpwq', x)
        x = x.reshape(x.shape[0], 3, h * patch_size, w * patch_size)
        feats.append(x)
    return tuple(feats)


# ----------------------------- deterministic parameter init -----------------------------

def init_params(key, in_channels, out_channel, intermediate_size):
    params = {"lateral": [], "fpn": []}
    for cin in in_channels:
        key, kw, kb = jax.random.split(key, 3)
        params["lateral"].append({
            "w": 0.02 * jax.random.normal(kw, (cin, out_channel), jnp.float32),
            "b": 0.02 * jax.random.normal(kb, (out_channel,), jnp.float32),
        })
    C, I = out_channel, intermediate_size
    for _ in in_channels:
        key, *ks = jax.random.split(key, 13)
        p = {
            "wq": 0.02 * jax.random.normal(ks[0], (C, C), jnp.float32),
            "wk": 0.02 * jax.random.normal(ks[1], (C, C), jnp.float32),
            "wv": 0.02 * jax.random.normal(ks[2], (C, C), jnp.float32),
            "wo": 0.02 * jax.random.normal(ks[3], (C, C), jnp.float32),
            "bq": 0.02 * jax.random.normal(ks[4], (C,), jnp.float32),
            "bk": 0.02 * jax.random.normal(ks[5], (C,), jnp.float32),
            "bv": 0.02 * jax.random.normal(ks[6], (C,), jnp.float32),
            "bo": 0.02 * jax.random.normal(ks[7], (C,), jnp.float32),
            "wi": 0.02 * jax.random.normal(ks[8], (C, I), jnp.float32),
            "bi": 0.02 * jax.random.normal(ks[9], (I,), jnp.float32),
            "w2": 0.02 * jax.random.normal(ks[10], (I, C), jnp.float32),
            "b2": 0.02 * jax.random.normal(ks[11], (C,), jnp.float32),
            "ln1_g": jnp.ones((C,), jnp.float32),
            "ln1_b": jnp.zeros((C,), jnp.float32),
            "ln2_g": jnp.ones((C,), jnp.float32),
            "ln2_b": jnp.zeros((C,), jnp.float32),
        }
        params["fpn"].append(p)
    return params


# ----------------------------- main -----------------------------

if __name__ == "__main__":
    # 2 pyramid levels, patch_size = 4, use_norm_pred = False => out_channel = 4*4*3 = 48
    in_channels = [8, 16]
    out_channel = 48
    patch_size = 4
    num_heads = 4        # assumed (BertConfig default 12 does not divide 48)
    intermediate = 96    # assumed small FFN width (BertConfig default is 3072)
    shapes = [(16, 16), (8, 8)]   # (H_i, W_i); 256 / 64 tokens -> exercises 2x2x2 flash grid
    batch = 2

    key = jax.random.PRNGKey(0)
    key, kx0, kx1, kp = jax.random.split(key, 4)
    inputs = [
        jax.random.normal(kx0, (batch, shapes[0][0] * shapes[0][1], in_channels[0]), jnp.float32),
        jax.random.normal(kx1, (batch, shapes[1][0] * shapes[1][1], in_channels[1]), jnp.float32),
    ]
    params = init_params(kp, in_channels, out_channel, intermediate)

    feats = fpn_crossattn_1d(params, inputs, shapes,
                             patch_size=patch_size, num_heads=num_heads)
    feats = jax.block_until_ready(feats)

    # sanity check against a pure-JAX f32 reference (kron-based upsample, full softmax).
    # Tolerance covers bf16 matmul operands + approx GELU/reciprocal on LayerNorm-scaled
    # (O(1)) outputs; measured deviation is ~1e-2 worst-case.
    ref = reference_forward(params, inputs, shapes,
                            patch_size=patch_size, num_heads=num_heads)
    expected_shapes = [(batch, 3, shapes[i][0] * patch_size, shapes[i][1] * patch_size)
                       for i in range(len(shapes))]
    for a, b, es in zip(feats, ref, expected_shapes):
        assert a.shape == es, (a.shape, es)
        err = float(jnp.max(jnp.abs(a - b)))
        assert err < 5e-2, f"kernel/reference mismatch: max abs err = {err}"

    print("KERNEL_OK")
</pallas_src>

<mosaic_0001>
module attributes {stable_mosaic.version = 11 : i64} {
  func.func @_pointwise_conv_kernel(%arg0: i32, %arg1: memref<16x128xf32, #tpu.memory_space<vmem>>, %arg2: memref<128x384xbf16, #tpu.memory_space<vmem>>, %arg3: memref<1x384xf32, #tpu.memory_space<vmem>>, %arg4: memref<16x384xf32, #tpu.memory_space<vmem>>) attributes {dimension_semantics = [#tpu.dimension_semantics<parallel>], iteration_bounds = array<i64: 1>, scalar_prefetch = 0 : i64, scratch_operands = 0 : i64, tpu.core_type = #tpu.core_type<tc>, window_params = [{transform_indices = @transform_0, window_bounds = array<i64: 16, 128>}, {pipeline_mode = #tpu.pipeline_mode<synchronous>, transform_indices = @transform_1, window_bounds = array<i64: 128, 384>}, {pipeline_mode = #tpu.pipeline_mode<synchronous>, transform_indices = @transform_2, window_bounds = array<i64: 1, 384>}, {transform_indices = @transform_3, window_bounds = array<i64: 16, 384>}]} {
    %c0 = arith.constant 0 : index
    %c0_0 = arith.constant 0 : index
    %0 = vector.load %arg1[%c0, %c0_0] : memref<16x128xf32, #tpu.memory_space<vmem>>, vector<16x128xf32>
    %1 = arith.truncf %0 : vector<16x128xf32> to vector<16x128xbf16>
    %c0_1 = arith.constant 0 : index
    %c0_2 = arith.constant 0 : index
    %2 = vector.load %arg2[%c0_1, %c0_2] : memref<128x384xbf16, #tpu.memory_space<vmem>>, vector<128x384xbf16>
    %cst = arith.constant dense<0.000000e+00> : vector<16x384xf32>
    %3 = tpu.matmul %1, %2, %cst {dimension_numbers = #tpu.dot_dimension_numbers<[1], [0], [0], [1], [0, 0, 1, 1], [], []>} : vector<16x128xbf16>, vector<128x384xbf16>, vector<16x384xf32> -> vector<16x384xf32>
    %c0_3 = arith.constant 0 : index
    %c0_4 = arith.constant 0 : index
    %4 = vector.load %arg3[%c0_3, %c0_4] : memref<1x384xf32, #tpu.memory_space<vmem>>, vector<1x384xf32>
    %5 = vector.broadcast %4 : vector<1x384xf32> to vector<16x384xf32>
    %6 = arith.addf %3, %5 : vector<16x384xf32>
    %c0_5 = arith.constant 0 : index
    %c0_6 = arith.constant 0 : index
    %7 = vector.load %arg4[%c0_5, %c0_6] : memref<16x384xf32, #tpu.memory_space<vmem>>, vector<16x384xf32>
    tpu.vector_store %arg4[%c0_5, %c0_6], %6 {strides = array<i32>} : memref<16x384xf32, #tpu.memory_space<vmem>>, vector<16x384xf32>,
    return
  }
  func.func @transform_0(%arg0: i32) -> (i32, i32) {
    %c0_i32 = arith.constant 0 : i32
    %c0_i32_0 = arith.constant 0 : i32
    return %arg0, %c0_i32 : i32, i32
  }
  func.func @transform_1(%arg0: i32) -> (i32, i32) {
    %c0_i32 = arith.constant 0 : i32
    %c0_i32_0 = arith.constant 0 : i32
    %c0_i32_1 = arith.constant 0 : i32
    return %c0_i32, %c0_i32_0 : i32, i32
  }
  func.func @transform_2(%arg0: i32) -> (i32, i32) {
    %c0_i32 = arith.constant 0 : i32
    %c0_i32_0 = arith.constant 0 : i32
    %c0_i32_1 = arith.constant 0 : i32
    return %c0_i32, %c0_i32_0 : i32, i32
  }
  func.func @transform_3(%arg0: i32) -> (i32, i32) {
    %c0_i32 = arith.constant 0 : i32
    %c0_i32_0 = arith.constant 0 : i32
    return %arg0, %c0_i32 : i32, i32
  }
}

</mosaic_0001>

<bundles_post_ra>
// kernel: tpu_custom_call.1
= control target key start
LH: loop header
LB: loop body
LE: loop exit
PB: predicated region body
PF: predicated region fallthrough
CT: control target
= control target key end

     0   :  { %8 = vsyncpa [#allocation3], 0  ;;  %s539_s0 = inlined_call_operand.hbm [shape: f32[16,128], index: 0, kind: input, shape index: {}]   ;;  %s540_s1 = inlined_call_operand.hbm [shape: bf16[128,384], index: 1, kind: input, shape index: {}]   ;;  %s541_s2 = inlined_call_operand.vmem [shape: f32[1,384], index: 2, kind: input, shape index: {}]   ;;  %s542_s3 = inlined_call_operand.hbm [shape: f32[16,384], index: 3, kind: output, shape index: {}]  }
   0x1   :  { %9 = vsyncpa [#allocation6], 0 }
   0x2   :  { %10 = vsyncpa [#allocation4], 0  ;;  %s495_s12 = smov [#allocation2]  }
   0x3   :  { %s16_s13 = sshll.u32 %s495_s12, 4  ;;  %s17_s13 = int_to_ptr.vmem [resolvable:$true] %s16_s13 }
   0x4   :  { %s437_s14 = scalar_lea.vmem %s17_s13, 256  ;;  %p442_p1 = scmp.lt.s32.totalorder %s17_s13, %s17_s13 }
   0x5   :  { %p438_p0 = scmp.ne.s32.totalorder %s17_s13, %s437_s14  ;;  %p443_p2 = scmp.lt.s32.totalorder %s437_s14, %s437_s14 }
   0x7   :  { %p444_p3 = por %p443_p2, %p442_p1 }
   0x9   :  { %p445_p4 = pnand %p444_p3, %p438_p0 }
   0xb   :  { %448 = shalt.err (!%p445_p4)
}
   0xc   :  { %s496_s15 = smov 128   ;;  %s497_s16 = smov 8  }
   0xd   :  { %22 = dma.hbm_to_vmem [thread:$0]  %s539_s0, 256, %s17_s13, [#allocation3], %s496_s15, %s496_s15, %s497_s16  }
   0xe   :  { %s498_s19 = smov [#allocation5]  }
   0xf   :  { %s28_s20 = sshll.u32 %s498_s19, 4  ;;  %s29_s20 = int_to_ptr.vmem [resolvable:$true] %s28_s20 }
  0x10   :  { %s457_s21 = scalar_lea.vmem %s29_s20, 3072  ;;  %p462_p6 = scmp.lt.s32.totalorder %s29_s20, %s29_s20 }
  0x11   :  { %p458_p5 = scmp.ne.s32.totalorder %s29_s20, %s457_s21  ;;  %p463_p7 = scmp.lt.s32.totalorder %s457_s21, %s457_s21 }
  0x13   :  { %p464_p8 = por %p463_p7, %p462_p6 }
  0x15   :  { %p465_p9 = pnand %p464_p8, %p458_p5 }
  0x17   :  { %468 = shalt.err (!%p465_p9)
}
  0x18   :  { %s499_s22 = smov 192   ;;  %s500_s23 = smov 12  }
  0x19   :  { %34 = dma.hbm_to_vmem [thread:$0]  %s540_s1, 3072, %s29_s20, [#allocation6], %s499_s22, %s499_s22, %s500_s23  }
  0x1a   :  { %489 = dma.done.wait [#allocation3], 256  }
  0x1b   :  { %490 = vsyncadd [#allocation3], 4294967040 }
  0x1c   :  { %491 = dma.done.wait [#allocation6], 3072  }
  0x1d   :  { %492 = vsyncadd [#allocation6], 4294964224  ;;  %v501_v0 = vmov 0.0   ;;  %vm502_vm0 = vmmov 0   ;;  %v503_v1 = vmov 0   ;;  %v44_v25 = vld [vmem:[#allocation2] sm:$0xff]  ;;  %v81_v29 = vlaneseq }
  0x1e   :  { %365 = vmatprep.subr.bf16.mxu1 %v501_v0  ;;  %381 = vmatprep.mubr.msk.bf16.mxu1 %vm502_vm0, %v501_v0  ;;  %v397_v2 = vld [vmem:[#allocation5 + $0xac] ss:$12 sps:$4 sm:$0xff]   ;;  %v399_v3 = vld [vmem:[#allocation5 + $0xb0] ss:$12 sps:$4 sm:$0xff]   ;;  %v400_v4 = vld [vmem:[#allocation5 + $0xa8] ss:$12 sps:$4 sm:$0xff]  }
  0x1f   :  { %256 = vmatprep.mubr.bf16.mxu0 %v503_v1  ;;  %224 = vmatprep.subr.bf16.mxu0 %v397_v2  ;;  %v401_v5 = vld [vmem:[#allocation5 + $0x94] ss:$12 sps:$4 sm:$0xff]   ;;  %v403_v6 = vld [vmem:[#allocation5 + $0x98] ss:$12 sps:$4 sm:$0xff]   ;;  %v404_v7 = vld [vmem:[#allocation5 + $0x90] ss:$12 sps:$4 sm:$0xff]  }
  0x20   :  { %366 = vmatpush3.bf16.msra.mxu1 %v399_v3  ;;  %225 = vmatpush1.bf16.msra.mxu0 %v400_v4  ;;  %v405_v8 = vld [vmem:[#allocation5 + $0x7c] ss:$12 sps:$4 sm:$0xff]   ;;  %v407_v9 = vld [vmem:[#allocation5 + $0x80] ss:$12 sps:$4 sm:$0xff]   ;;  %v408_v10 = vld [vmem:[#allocation5 + $0x78] ss:$12 sps:$4 sm:$0xff]  }
  0x21   :  { %367 = vmatprep.subr.bf16.mxu1 %v501_v0  ;;  %226 = vmatprep.subr.bf16.mxu0 %v401_v5  ;;  %v409_v11 = vld [vmem:[#allocation5 + $0x64] ss:$12 sps:$4 sm:$0xff]   ;;  %v411_v12 = vld [vmem:[#allocation5 + $0x68] ss:$12 sps:$4 sm:$0xff]   ;;  %v412_v13 = vld [vmem:[#allocation5 + $0x60] ss:$12 sps:$4 sm:$0xff]  }
  0x22   :  { %v413_v14 = vld [vmem:[#allocation5 + $0x4c] ss:$12 sps:$4 sm:$0xff]   ;;  %v415_v15 = vld [vmem:[#allocation5 + $0x50] ss:$12 sps:$4 sm:$0xff]   ;;  %v416_v16 = vld [vmem:[#allocation5 + $0x48] ss:$12 sps:$4 sm:$0xff]  }
  0x23   :  { %v417_v17 = vld [vmem:[#allocation5 + $0x34] ss:$12 sps:$4 sm:$0xff]   ;;  %v419_v18 = vld [vmem:[#allocation5 + $0x38] ss:$12 sps:$4 sm:$0xff]   ;;  %v420_v19 = vld [vmem:[#allocation5 + $0x30] ss:$12 sps:$4 sm:$0xff]  }
  0x24   :  { %368 = vmatpush3.bf16.msra.mxu1 %v403_v6  ;;  %227 = vmatpush1.bf16.msra.mxu0 %v404_v7  ;;  %v421_v20 = vld [vmem:[#allocation5 + $0x1c] ss:$12 sps:$4 sm:$0xff]   ;;  %v423_v21 = vld [vmem:[#allocation5 + $0x20] ss:$12 sps:$4 sm:$0xff]   ;;  %v424_v22 = vld [vmem:[#allocation5 + $0x18] ss:$12 sps:$4 sm:$0xff]  }
  0x25   :  { %369 = vmatprep.subr.bf16.mxu1 %v501_v0  ;;  %228 = vmatprep.subr.bf16.mxu0 %v405_v8  ;;  %v425_v23 = vld [vmem:[#allocation5 + $0x4] ss:$12 sps:$4 sm:$0xff]   ;;  %v427_v24 = vld [vmem:[#allocation5 + $0x8] ss:$12 sps:$4 sm:$0xff]   ;;  %v45_v26 = vld [vmem:[#allocation2 + $0x8] sm:$0xff]  ;;  %v82_v30 = vshrl.u32 %v81_v29, 7 }
  0x26   :  { %v428_v27 = vld [vmem:[#allocation5] ss:$12 sps:$4 sm:$0xff]   ;;  %v46_v28 = vpack.c.bf16 %v45_v26, %v44_v25  ;;  %v79_v33 = vld [vmem:[%s541_s2] sm:$0x7]  ;;  %s504_s26 = smov [#allocation7]  }
  0x27   :  { %v91_v31 = vsub.s32 2, %v82_v30  ;;  %v83_v32 = vsub.s32 0, %v82_v30  ;;  %v87_v34 = vsub.s32 1, %v82_v30  ;;  %s319_s27 = sshll.u32 %s504_s26, 4  ;;  %s320_s27 = int_to_ptr.vmem [resolvable:$true] %s319_s27 }
  0x28   :  { %370 = vmatpush3.bf16.msra.mxu1 %v407_v9  ;;  %229 = vmatpush1.bf16.msra.mxu0 %v408_v10  ;;  %s469_s2 = scalar_lea.vmem %s320_s27, 768  ;;  %p474_p11 = scmp.lt.s32.totalorder %s320_s27, %s320_s27 }
  0x29   :  { %371 = vmatprep.subr.bf16.mxu1 %v501_v0  ;;  %230 = vmatprep.subr.bf16.mxu0 %v409_v11  ;;  %v92_v35 = vrot.slane %v79_v33, %v91_v31  ;;  %v84_v36 = vrot.slane %v79_v33, %v83_v32  ;;  %v88_v38 = vrot.slane %v79_v33, %v87_v34  ;;  %p470_p10 = scmp.ne.s32.totalorder %s320_s27, %s469_s2  ;;  %p475_p12 = scmp.lt.s32.totalorder %s469_s2, %s469_s2 }
  0x2b   :  { %p476_p13 = por %p475_p12, %p474_p11 }
  0x2c   :  { %372 = vmatpush3.bf16.msra.mxu1 %v411_v12  ;;  %231 = vmatpush1.bf16.msra.mxu0 %v412_v13 }
  0x2d   :  { %373 = vmatprep.subr.bf16.mxu1 %v501_v0  ;;  %232 = vmatprep.subr.bf16.mxu0 %v413_v14  ;;  %p477_p0 = pnand %p476_p13, %p470_p10 }
  0x30   :  { %374 = vmatpush3.bf16.msra.mxu1 %v415_v15  ;;  %233 = vmatpush1.bf16.msra.mxu0 %v416_v16 }
  0x31   :  { %375 = vmatprep.subr.bf16.mxu1 %v501_v0  ;;  %234 = vmatprep.subr.bf16.mxu0 %v417_v17 }
  0x34   :  { %376 = vmatpush3.bf16.msra.mxu1 %v419_v18  ;;  %235 = vmatpush1.bf16.msra.mxu0 %v420_v19 }
  0x35   :  { %377 = vmatprep.subr.bf16.mxu1 %v501_v0  ;;  %236 = vmatprep.subr.bf16.mxu0 %v421_v20 }
  0x38   :  { %378 = vmatpush3.bf16.msra.mxu1 %v423_v21  ;;  %237 = vmatpush1.bf16.msra.mxu0 %v424_v22 }
  0x39   :  { %379 = vmatprep.subr.bf16.mxu1 %v501_v0  ;;  %238 = vmatprep.subr.bf16.mxu0 %v425_v23 }
  0x3c   :  { %380 = vmatpush3.bf16.msra.mxu1 %v427_v24  ;;  %239 = vmatpush1.bf16.msra.mxu0 %v428_v27 }
  0x3f   :  { %382 = vmatmul.mubr.bf16.vlgmr.msra.gmra.mxu1 %v46_v28  ;;  %257 = vmatmul.mubr.bf16.vlgmr.msra.gmra.mxu0 %v46_v28 }
  0xff   :  { %v301_v37 = vpop.f32.mrf.mxu1  ;;  %v258_v40 = vpop.f32.mrf.mxu0 }
 0x100   :  { %v302_v39 = vadd.f32 %v301_v37, %v92_v35  ;;  %v259_v41 = vadd.f32 %v258_v40, %v84_v36 }
 0x101   :  { %v383_v42 = vpop.f32.mrf.mxu1  ;;  %v260_v43 = vpop.f32.mrf.mxu0 }
 0x102   :  { %310 = vst [vmem:[#allocation7 + $0x10] sm:$0xff] %v302_v39  ;;  %308 = vst [vmem:[#allocation7] sm:$0xff] %v259_v41  ;;  %v261_v44 = vadd.f32 %v260_v43, %v88_v38 }
 0x103   :  { %v304_v45 = vpop.f32.mrf.mxu1  ;;  %v262_v47 = vpop.f32.mrf.mxu0 }
 0x104   :  { %v305_v46 = vadd.f32 %v304_v45, %v92_v35  ;;  %309 = vst [vmem:[#allocation7 + $0x8] sm:$0xff] %v261_v44  ;;  %v263_v48 = vadd.f32 %v262_v47, %v84_v36 }
 0x105   :  { %v384_v49 = vpop.f32.mrf.mxu1  ;;  %v264_v50 = vpop.f32.mrf.mxu0 }
 0x106   :  { %313 = vst [vmem:[#allocation7 + $0x28] sm:$0xff] %v305_v46  ;;  %311 = vst [vmem:[#allocation7 + $0x18] sm:$0xff] %v263_v48  ;;  %v265_v51 = vadd.f32 %v264_v50, %v88_v38 }
 0x108   :  { %312 = vst [vmem:[#allocation7 + $0x20] sm:$0xff] %v265_v51 }
 0x109   :  { %480 = shalt.err (!%p477_p0)
}
 0x10a   :  { %s505_s28 = smov 384   ;;  %s506_s29 = smov 24  }
 0x10b   :  { %325 = dma.vmem_to_hbm [thread:$0]  %s320_s27, 768, %s542_s3, [#allocation4], %s505_s28, %s505_s28, %s506_s29  }
 0x10c   :  { %493 = dma.done.wait [#allocation4], 768  }
 0x10d   :  { %494 = vsyncadd [#allocation4], 4294966528 }
 0x10e   :  { %329 = vsyncpa [#allocation3], 1 }
 0x10f   :  { %330 = vsyncpa [#allocation6], 1 }
 0x110   :  { %331 = vsyncpa [#allocation4], 1 }

</bundles_post_ra>
